<compile_context>
chip_gen: v7x
topology: tpu7x:2x2x1
jax: 0.10.0
libtpu: 0.0.40
codegen_flags: <defaults>
</compile_context>

<pallas_src>
import functools
import math

import jax
import jax.numpy as jnp
import numpy as np
from jax.experimental import pallas as pl
from jax.experimental.pallas import tpu as pltpu


def _round_up(x, m):
    return ((x + m - 1) // m) * m


def _soft_rnn_gate_kernel(hidden_dim,
                          x_ref, h_ref, c_ref,
                          wih_ref, whh_ref, b_ref,
                          wproj_ref, bproj_ref,
                          out_ref):
    # x: (B, D) bf16, h/c: (B, H) f32, wih: (D, 4H) bf16, whh: (H, 4H) bf16,
    # b: (1, 4H) f32, wproj: (1, H) f32, bproj: (1, 1) f32.
    # out: (B, P) f32 packed as [prob | h' | c' | zero pad], P = roundup(1+2H, 128).
    H = hidden_dim
    x = x_ref[...]                                    # bf16
    h = h_ref[...].astype(jnp.bfloat16)               # bf16 operand for MXU
    c = c_ref[...]                                    # f32

    # (B, 4H) pre-activations; bf16 x bf16 on the MXU, f32 accumulation.
    gates = (jnp.dot(x, wih_ref[...], preferred_element_type=jnp.float32)
             + jnp.dot(h, whh_ref[...], preferred_element_type=jnp.float32)
             + b_ref[...])

    # PyTorch LSTM gate order: i, f, g, o — only g uses tanh.  One sigmoid +
    # one tanh over the full lane-dense (B, 4H) tile, selected by lane index.
    lane = jax.lax.broadcasted_iota(jnp.int32, gates.shape, dimension=1)
    is_g = jnp.logical_and(lane >= 2 * H, lane < 3 * H)
    act = jnp.where(is_g, jnp.tanh(gates), jax.nn.sigmoid(gates))

    i_g = act[:, 0 * H:1 * H]
    f_g = act[:, 1 * H:2 * H]
    g_g = act[:, 2 * H:3 * H]
    o_g = act[:, 3 * H:4 * H]

    c_new = f_g * c + i_g * g_g
    h_new = o_g * jnp.tanh(c_new)

    # hidden -> 1 projection: VPU multiply + lane reduction (no MXU pass on
    # the serial dependency chain).
    proj = (jnp.sum(h_new * wproj_ref[...], axis=-1, keepdims=True)
            + bproj_ref[...])                         # (B, 1) f32
    prob = jax.nn.sigmoid(proj)

    # Single lane-dense packed store: [prob | h' | c' | pad].
    B = h_new.shape[0]
    pad = out_ref.shape[1] - (1 + 2 * H)
    parts = [prob, h_new, c_new]
    if pad > 0:
        parts.append(jnp.zeros((B, pad), jnp.float32))
    out_ref[...] = jnp.concatenate(parts, axis=-1)


def soft_rnn_gate_forward(x_nchw, hidden, params, training=True):
    """Pallas implementation of SoftRNNGate.forward.

    x_nchw : (B, C, H, W) -> flattened to (B, C*H*W), cast to bf16 for the MXU
    hidden : (h0, c0), each (B, hidden_dim) float32
    params : dict (see init_params); LSTM weights stored bf16, transposed to
             right-matmul layout.
    Returns ((gate (B,1,1,1), prob (B,1)), (h_new, c_new)).
    """
    B = x_nchw.shape[0]
    x2 = x_nchw.reshape(B, -1).astype(jnp.bfloat16)
    h0, c0 = hidden
    hdim = h0.shape[1]
    packed_w = _round_up(1 + 2 * hdim, 128)

    vmem = pl.BlockSpec(memory_space=pltpu.MemorySpace.VMEM)
    packed = pl.pallas_call(
        functools.partial(_soft_rnn_gate_kernel, hdim),
        out_shape=jax.ShapeDtypeStruct((B, packed_w), jnp.float32),
        in_specs=[vmem] * 8,
        out_specs=vmem,
    )(x2, h0.astype(jnp.float32), c0.astype(jnp.float32),
      params["w_ih_t"], params["w_hh_t"], params["b"],
      params["w_proj"], params["b_proj"])

    prob = packed[:, 0:1]
    h_new = packed[:, 1:1 + hdim]
    c_new = packed[:, 1 + hdim:1 + 2 * hdim]

    gate = prob
    if not training:
        gate = (gate > 0.5).astype(jnp.float32)
    gate = gate.reshape(B, 1, 1, 1)
    return (gate, prob), (h_new, c_new)


def init_params(key, input_dim, hidden_dim):
    """Deterministic init mimicking PyTorch defaults (uniform +/- 1/sqrt(fan)).

    LSTM matmul weights are stored as bf16 (bandwidth); biases / projection
    stay f32 (added after f32 accumulation / used on the VPU)."""
    k = jax.random.split(key, 6)
    stdv = 1.0 / math.sqrt(hidden_dim)
    w_ih = jax.random.uniform(k[0], (4 * hidden_dim, input_dim),
                              jnp.float32, -stdv, stdv)
    w_hh = jax.random.uniform(k[1], (4 * hidden_dim, hidden_dim),
                              jnp.float32, -stdv, stdv)
    b_ih = jax.random.uniform(k[2], (4 * hidden_dim,), jnp.float32, -stdv, stdv)
    b_hh = jax.random.uniform(k[3], (4 * hidden_dim,), jnp.float32, -stdv, stdv)
    w_proj = jax.random.uniform(k[4], (1, hidden_dim), jnp.float32, -stdv, stdv)
    b_proj = jax.random.uniform(k[5], (1,), jnp.float32, -stdv, stdv)
    return {
        "w_ih_t": w_ih.T.astype(jnp.bfloat16),        # (D, 4H) bf16
        "w_hh_t": w_hh.T.astype(jnp.bfloat16),        # (H, 4H) bf16
        "b": (b_ih + b_hh).reshape(1, -1),            # (1, 4H) f32
        "w_proj": w_proj,                             # (1, H)  f32
        "b_proj": b_proj.reshape(1, 1),               # (1, 1)  f32
    }


def _reference_forward(x_nchw, hidden, params, training=True):
    """Pure-JAX reference using the same (bf16-rounded) operands."""
    B = x_nchw.shape[0]
    x2 = x_nchw.reshape(B, -1).astype(jnp.bfloat16).astype(jnp.float32)
    h0, c0 = hidden
    H = h0.shape[1]
    wih = params["w_ih_t"].astype(jnp.float32)
    whh = params["w_hh_t"].astype(jnp.float32)
    gates = x2 @ wih + h0 @ whh + params["b"]
    i_g = jax.nn.sigmoid(gates[:, 0 * H:1 * H])
    f_g = jax.nn.sigmoid(gates[:, 1 * H:2 * H])
    g_g = jnp.tanh(gates[:, 2 * H:3 * H])
    o_g = jax.nn.sigmoid(gates[:, 3 * H:4 * H])
    c_new = f_g * c0 + i_g * g_g
    h_new = o_g * jnp.tanh(c_new)
    prob = jax.nn.sigmoid(h_new @ params["w_proj"].T + params["b_proj"])
    gate = prob if training else (prob > 0.5).astype(jnp.float32)
    return (gate.reshape(B, 1, 1, 1), prob), (h_new, c_new)


if __name__ == "__main__":
    key = jax.random.PRNGKey(0)
    kx, kp = jax.random.split(key)

    B, C, Hs, Ws = 2, 4, 16, 16
    hidden_dim = 32
    input_dim = C * Hs * Ws

    x = jax.random.normal(kx, (B, C, Hs, Ws), jnp.float32)
    params = init_params(kp, input_dim, hidden_dim)

    # init_hidden(batch_size): zeros for both h0 and c0
    h0 = jnp.zeros((B, hidden_dim), jnp.float32)
    c0 = jnp.zeros((B, hidden_dim), jnp.float32)

    (gate, prob), (h_new, c_new) = soft_rnn_gate_forward(
        x, (h0, c0), params, training=True)
    jax.block_until_ready((gate, prob, h_new, c_new))

    assert gate.shape == (B, 1, 1, 1)
    assert prob.shape == (B, 1)
    assert h_new.shape == (B, hidden_dim) and c_new.shape == (B, hidden_dim)

    # numerical check against a pure-JAX reference (same bf16 weights, f32 math)
    (gate_r, prob_r), (h_r, c_r) = _reference_forward(
        x, (h0, c0), params, training=True)
    np.testing.assert_allclose(np.asarray(prob), np.asarray(prob_r), atol=2e-2)
    np.testing.assert_allclose(np.asarray(h_new), np.asarray(h_r), atol=2e-2)
    np.testing.assert_allclose(np.asarray(c_new), np.asarray(c_r), atol=2e-2)

    # also exercise the eval-mode (hard-threshold) path
    (gate_eval, prob_eval), _ = soft_rnn_gate_forward(
        x, (h0, c0), params, training=False)
    jax.block_until_ready((gate_eval, prob_eval))
    assert gate_eval.shape == (B, 1, 1, 1)
    assert set(np.unique(np.asarray(gate_eval))).issubset({0.0, 1.0})

    print("KERNEL_OK")
</pallas_src>

<mosaic_0001>
module attributes {stable_mosaic.version = 11 : i64} {
  func.func @_soft_rnn_gate_kernel(%arg0: memref<2x1024xbf16, #tpu.memory_space<vmem>>, %arg1: memref<2x32xf32, #tpu.memory_space<vmem>>, %arg2: memref<2x32xf32, #tpu.memory_space<vmem>>, %arg3: memref<1024x128xbf16, #tpu.memory_space<vmem>>, %arg4: memref<32x128xbf16, #tpu.memory_space<vmem>>, %arg5: memref<1x128xf32, #tpu.memory_space<vmem>>, %arg6: memref<1x32xf32, #tpu.memory_space<vmem>>, %arg7: memref<1x1xf32, #tpu.memory_space<vmem>>, %arg8: memref<2x128xf32, #tpu.memory_space<vmem>>) attributes {dimension_semantics = [], scalar_prefetch = 0 : i64, scratch_operands = 0 : i64, tpu.core_type = #tpu.core_type<tc>} {
    %c0 = arith.constant 0 : index
    %c0_0 = arith.constant 0 : index
    %0 = vector.load %arg0[%c0, %c0_0] : memref<2x1024xbf16, #tpu.memory_space<vmem>>, vector<2x1024xbf16>
    %c0_1 = arith.constant 0 : index
    %c0_2 = arith.constant 0 : index
    %1 = vector.load %arg1[%c0_1, %c0_2] : memref<2x32xf32, #tpu.memory_space<vmem>>, vector<2x32xf32>
    %2 = arith.truncf %1 : vector<2x32xf32> to vector<2x32xbf16>
    %c0_3 = arith.constant 0 : index
    %c0_4 = arith.constant 0 : index
    %3 = vector.load %arg2[%c0_3, %c0_4] : memref<2x32xf32, #tpu.memory_space<vmem>>, vector<2x32xf32>
    %c0_5 = arith.constant 0 : index
    %c0_6 = arith.constant 0 : index
    %4 = vector.load %arg3[%c0_5, %c0_6] : memref<1024x128xbf16, #tpu.memory_space<vmem>>, vector<1024x128xbf16>
    %cst = arith.constant dense<0.000000e+00> : vector<2x128xf32>
    %5 = tpu.matmul %0, %4, %cst {dimension_numbers = #tpu.dot_dimension_numbers<[1], [0], [0], [1], [0, 0, 1, 1], [], []>} : vector<2x1024xbf16>, vector<1024x128xbf16>, vector<2x128xf32> -> vector<2x128xf32>
    %c0_7 = arith.constant 0 : index
    %c0_8 = arith.constant 0 : index
    %6 = vector.load %arg4[%c0_7, %c0_8] : memref<32x128xbf16, #tpu.memory_space<vmem>>, vector<32x128xbf16>
    %cst_9 = arith.constant dense<0.000000e+00> : vector<2x128xf32>
    %7 = tpu.matmul %2, %6, %cst_9 {dimension_numbers = #tpu.dot_dimension_numbers<[1], [0], [0], [1], [0, 0, 1, 1], [], []>} : vector<2x32xbf16>, vector<32x128xbf16>, vector<2x128xf32> -> vector<2x128xf32>
    %8 = arith.addf %5, %7 : vector<2x128xf32>
    %c0_10 = arith.constant 0 : index
    %c0_11 = arith.constant 0 : index
    %9 = vector.load %arg5[%c0_10, %c0_11] : memref<1x128xf32, #tpu.memory_space<vmem>>, vector<1x128xf32>
    %10 = vector.broadcast %9 : vector<1x128xf32> to vector<2x128xf32>
    %11 = arith.addf %8, %10 : vector<2x128xf32>
    %12 = tpu.iota {dimensions = array<i32: 1>} : vector<2x128xi32>
    %c64_i32 = arith.constant 64 : i32
    %13 = vector.broadcast %c64_i32 : i32 to vector<2x128xi32>
    %14 = arith.cmpi sge, %12, %13 : vector<2x128xi32>
    %c96_i32 = arith.constant 96 : i32
    %15 = vector.broadcast %c96_i32 : i32 to vector<2x128xi32>
    %16 = arith.cmpi slt, %12, %15 : vector<2x128xi32>
    %17 = arith.andi %14, %16 : vector<2x128xi1>
    %18 = math.tanh %11 : vector<2x128xf32>
    %19 = arith.negf %11 : vector<2x128xf32>
    %20 = math.exp %19 : vector<2x128xf32>
    %cst_12 = arith.constant 1.000000e+00 : f32
    %21 = vector.broadcast %cst_12 : f32 to vector<2x128xf32>
    %22 = arith.addf %21, %20 : vector<2x128xf32>
    %23 = arith.divf %21, %22 : vector<2x128xf32>
    %24 = arith.select %17, %18, %23 : vector<2x128xi1>, vector<2x128xf32>
    %25 = vector.extract_strided_slice %24 {offsets = [0, 0], sizes = [2, 32], strides = [1, 1]} : vector<2x128xf32> to vector<2x32xf32>
    %26 = vector.extract_strided_slice %24 {offsets = [0, 32], sizes = [2, 32], strides = [1, 1]} : vector<2x128xf32> to vector<2x32xf32>
    %27 = vector.extract_strided_slice %24 {offsets = [0, 64], sizes = [2, 32], strides = [1, 1]} : vector<2x128xf32> to vector<2x32xf32>
    %28 = vector.extract_strided_slice %24 {offsets = [0, 96], sizes = [2, 32], strides = [1, 1]} : vector<2x128xf32> to vector<2x32xf32>
    %29 = arith.mulf %26, %3 : vector<2x32xf32>
    %30 = arith.mulf %25, %27 : vector<2x32xf32>
    %31 = arith.addf %29, %30 : vector<2x32xf32>
    %32 = math.tanh %31 : vector<2x32xf32>
    %33 = arith.mulf %28, %32 : vector<2x32xf32>
    %c0_13 = arith.constant 0 : index
    %c0_14 = arith.constant 0 : index
    %34 = vector.load %arg6[%c0_13, %c0_14] : memref<1x32xf32, #tpu.memory_space<vmem>>, vector<1x32xf32>
    %35 = vector.broadcast %34 : vector<1x32xf32> to vector<2x32xf32>
    %36 = arith.mulf %33, %35 : vector<2x32xf32>
    %cst_15 = arith.constant dense<0.000000e+00> : vector<2xf32>
    %37 = vector.multi_reduction <add>, %36, %cst_15 [1] : vector<2x32xf32> to vector<2xf32>
    %38 = vector.shape_cast %37 : vector<2xf32> to vector<2x1xf32>
    %c0_16 = arith.constant 0 : index
    %c0_17 = arith.constant 0 : index
    %39 = vector.load %arg7[%c0_16, %c0_17] : memref<1x1xf32, #tpu.memory_space<vmem>>, vector<1x1xf32>
    %40 = vector.broadcast %39 : vector<1x1xf32> to vector<2x1xf32>
    %41 = arith.addf %38, %40 : vector<2x1xf32>
    %42 = arith.negf %41 : vector<2x1xf32>
    %43 = math.exp %42 : vector<2x1xf32>
    %cst_18 = arith.constant 1.000000e+00 : f32
    %44 = vector.broadcast %cst_18 : f32 to vector<2x1xf32>
    %45 = arith.addf %44, %43 : vector<2x1xf32>
    %46 = arith.divf %44, %45 : vector<2x1xf32>
    %cst_19 = arith.constant 0.000000e+00 : f32
    %47 = vector.broadcast %cst_19 : f32 to vector<2x63xf32>
    %48 = tpu.concatenate %46, %33, %31, %47 in 1 : vector<2x1xf32>, vector<2x32xf32>, vector<2x32xf32>, vector<2x63xf32> -> vector<2x128xf32>
    %c0_20 = arith.constant 0 : index
    %c0_21 = arith.constant 0 : index
    %49 = vector.load %arg8[%c0_20, %c0_21] : memref<2x128xf32, #tpu.memory_space<vmem>>, vector<2x128xf32>
    tpu.vector_store %arg8[%c0_20, %c0_21], %48 {strides = array<i32>} : memref<2x128xf32, #tpu.memory_space<vmem>>, vector<2x128xf32>,
    return
  }
}

</mosaic_0001>

<bundles_post_ra>
// kernel: tpu_custom_call.1
= control target key start
LH: loop header
LB: loop body
LE: loop exit
PB: predicated region body
PF: predicated region fallthrough
CT: control target
= control target key end

     0   :  { %s1469_s0 = inlined_call_operand.hbm [shape: bf16[2,1024], index: 0, kind: input, shape index: {}]   ;;  %s1470_s1 = inlined_call_operand.vmem [shape: f32[2,32], index: 1, kind: input, shape index: {}]   ;;  %s1471_s2 = inlined_call_operand.hbm [shape: f32[2,32], index: 2, kind: input, shape index: {}]   ;;  %s1472_s3 = inlined_call_operand.hbm [shape: bf16[1024,128], index: 3, kind: input, shape index: {}]   ;;  %s1473_s4 = inlined_call_operand.vmem [shape: bf16[32,128], index: 4, kind: input, shape index: {}]   ;;  %s1474_s5 = inlined_call_operand.vmem [shape: f32[1,128], index: 5, kind: input, shape index: {}]   ;;  %s1475_s6 = inlined_call_operand.vmem [shape: f32[1,32], index: 6, kind: input, shape index: {}]   ;;  %s1476_s7 = inlined_call_operand.<no memory space> [shape: f32[1,1], index: 7, kind: input, shape index: {}]   ;;  %s1477_s8 = inlined_call_operand.hbm [shape: f32[2,128], index: 8, kind: output, shape index: {}]  }
   0x1   :  { %v13_v0 = vstv %s1476_s7 }
   0x2   :  { %14 = vst [vmem:[#allocation2] sm:$0x1] %v13_v0 }
   0x3   :  { %15 = vsyncpa [#allocation4], 0 }
   0x4   :  { %16 = vsyncpa [#allocation7], 0 }
   0x5   :  { %17 = vsyncpa [#allocation5], 0  ;;  %s1326_s29 = smov [#allocation6]   ;;  %s1327_s9 = smov [#allocation3]  }
   0x6   :  { %s36_s30 = sshll.u32 %s1326_s29, 4  ;;  %s24_s10 = sshll.u32 %s1327_s9, 4  ;;  %s37_s30 = int_to_ptr.vmem [resolvable:$true] %s36_s30  ;;  %s25_s10 = int_to_ptr.vmem [resolvable:$true] %s24_s10 }
   0x7   :  { %s1232_s13 = scalar_lea.hbm %s1471_s2, 32 }
   0x8   :  { %p1233_p0 = scmp.ne.s32.totalorder %s1471_s2, %s1232_s13  ;;  %p1236_p1 = scmp.lt.u32.totalorder %s1232_s13, %s1471_s2 }
   0xa   :  { %p1238_p2 = pnand %p1236_p1, %p1233_p0 }
   0xc   :  { %1241 = shalt.err (!%p1238_p2)
}
   0xd   :  { %s1242_s17 = scalar_lea.vmem %s37_s30, 32  ;;  %p1247_p4 = scmp.lt.s32.totalorder %s37_s30, %s37_s30 }
   0xe   :  { %p1243_p3 = scmp.ne.s32.totalorder %s37_s30, %s1242_s17  ;;  %p1248_p5 = scmp.lt.s32.totalorder %s1242_s17, %s1242_s17 }
  0x10   :  { %p1249_p6 = por %p1248_p5, %p1247_p4 }
  0x12   :  { %p1250_p7 = pnand %p1249_p6, %p1243_p3 }
  0x14   :  { %1253 = shalt.err (!%p1250_p7)
}
  0x15   :  { %39 = dma.hbm_to_vmem [thread:$0]  %s1471_s2, 32, %s37_s30, [#allocation7]  }
  0x16   :  { %s1254_s22 = scalar_lea.hbm %s1469_s0, 128 }
  0x17   :  { %p1255_p8 = scmp.ne.s32.totalorder %s1469_s0, %s1254_s22  ;;  %p1258_p9 = scmp.lt.u32.totalorder %s1254_s22, %s1469_s0 }
  0x19   :  { %p1260_p10 = pnand %p1258_p9, %p1255_p8 }
  0x1b   :  { %1263 = shalt.err (!%p1260_p10)
}
  0x1c   :  { %s1264_s27 = scalar_lea.vmem %s25_s10, 128  ;;  %p1269_p12 = scmp.lt.s32.totalorder %s25_s10, %s25_s10 }
  0x1d   :  { %p1265_p11 = scmp.ne.s32.totalorder %s25_s10, %s1264_s27  ;;  %p1270_p13 = scmp.lt.s32.totalorder %s1264_s27, %s1264_s27 }
  0x1f   :  { %p1271_p0 = por %p1270_p13, %p1269_p12 }
  0x21   :  { %p1272_p1 = pnand %p1271_p0, %p1265_p11 }
  0x23   :  { %1275 = shalt.err (!%p1272_p1)
}
  0x24   :  { %27 = dma.hbm_to_vmem [thread:$0]  %s1469_s0, 128, %s25_s10, [#allocation4]  }
  0x25   :  { %s1328_s29 = smov [#allocation8]   ;;  %s1276_s12 = scalar_lea.hbm %s1472_s3, 8192 }
  0x26   :  { %s45_s30 = sshll.u32 %s1328_s29, 4  ;;  %p1277_p2 = scmp.ne.s32.totalorder %s1472_s3, %s1276_s12  ;;  %s46_s30 = int_to_ptr.vmem [resolvable:$true] %s45_s30 }
  0x27   :  { %p1280_p3 = scmp.lt.u32.totalorder %s1276_s12, %s1472_s3 }
  0x29   :  { %p1282_p4 = pnand %p1280_p3, %p1277_p2 }
  0x2b   :  { %1285 = shalt.err (!%p1282_p4)
}
  0x2c   :  { %s1286_s7 = scalar_lea.vmem %s46_s30, 8192  ;;  %p1291_p6 = scmp.lt.s32.totalorder %s46_s30, %s46_s30 }
  0x2d   :  { %p1287_p5 = scmp.ne.s32.totalorder %s46_s30, %s1286_s7  ;;  %p1292_p7 = scmp.lt.s32.totalorder %s1286_s7, %s1286_s7 }
  0x2f   :  { %p1293_p8 = por %p1292_p7, %p1291_p6 }
  0x31   :  { %p1294_p9 = pnand %p1293_p8, %p1287_p5 }
  0x33   :  { %1297 = shalt.err (!%p1294_p9)
}
  0x34   :  { %s1329_s0 = smov 64   ;;  %s1330_s10 = smov 4  }
  0x35   :  { %51 = dma.hbm_to_vmem [thread:$0]  %s1472_s3, 8192, %s46_s30, [#allocation7], %s1329_s0, %s1329_s0, %s1330_s10  }
  0x36   :  { %1320 = dma.done.wait [#allocation4], 128  }
  0x37   :  { %1321 = vsyncadd [#allocation4], 4294967168 }
  0x38   :  { %1322 = dma.done.wait [#allocation7], 8224  }
  0x39   :  { %1323 = vsyncadd [#allocation7], 4294959072  ;;  %v1331_v1 = vmov 0.0   ;;  %vm1332_vm0 = vmmov 0   ;;  %v1153_v2 = vld [vmem:[%s1473_s4] sm:$0xff]   ;;  %v1154_v3 = vld [vmem:[#allocation8 + $0x40] sm:$0xff]   ;;  %v267_v25 = vlaneseq }
  0x3a   :  { %1132 = vmatprep.subr.bf16.mxu0 %v1331_v1  ;;  %1136 = vmatprep.mubr.msk.bf16.mxu0 %vm1332_vm0, %v1331_v1  ;;  %v1155_v4 = vld [vmem:[#allocation8] sm:$0xff]   ;;  %v1157_v6 = vld [vmem:[#allocation8 + $0x48] sm:$0xff]   ;;  %vm218_vm1 = vcmask 261120   ;;  %v71_v8 = vld [vmem:[%s1470_s1] sm:$0x3]  ;;  %s1335_s26 = smov 96  }
  0x3b   :  { %1133 = vmatpush3.bf16.msra.mxu0 %v1153_v2  ;;  %1044 = vmatprep.subr.bf16.mxu1 %v1154_v3  ;;  %v1156_v5 = vld [vmem:[%s1473_s4 + $0x8] sm:$0xff]   ;;  %v1158_v7 = vld [vmem:[#allocation8 + $0x8] sm:$0xff]   ;;  %v72_v9 = vpack.c.bf16 %v71_v8, %v71_v8  ;;  %v1160_v11 = vld [vmem:[#allocation8 + $0x50] sm:$0xff]   ;;  %v1333_v23 = vmov 1966171168   ;;  %v268_v31 = vshrl.u32 %v267_v25, 7 }
  0x3c   :  { %1134 = vmatprep.subr.bf16.mxu0 %v1331_v1  ;;  %1045 = vmatpush3.bf16.msra.mxu1 %v1155_v4  ;;  %v1159_v10 = vld [vmem:[#allocation8 + $0xc0] sm:$0xff]   ;;  %v1162_v13 = vld [vmem:[#allocation8 + $0x10] sm:$0xff]   ;;  %v1163_v14 = vld [vmem:[#allocation8 + $0xc8] sm:$0xff]   ;;  %v265_v24 = vunpack.c.l.s4 %v1333_v23  ;;  %s1336_s27 = smov 33   ;;  %s1337_s2 = smov 1   ;;  %vm920_vm5 = vcmask 254976  }
  0x3d   :  { %1046 = vmatprep.subr.bf16.mxu1 %v1157_v6  ;;  %v1161_v12 = vld [vmem:[#allocation8 + $0x80] sm:$0xff]   ;;  %v1164_v15 = vld [vmem:[#allocation8 + $0x58] sm:$0xff]   ;;  %v1165_v16 = vld [vmem:[#allocation8 + $0x88] sm:$0xff]   ;;  %vm946_vm6 = vcmask 7168   ;;  %vm948_vm7 = vcmask 269312   ;;  %vm950_vm8 = vcmask 531456  }
  0x3e   :  { %v1166_v17 = vld [vmem:[#allocation8 + $0x18] sm:$0xff]   ;;  %v1167_v18 = vld [vmem:[#allocation8 + $0xd0] sm:$0xff]   ;;  %v1168_v19 = vld [vmem:[#allocation8 + $0x60] sm:$0xff]   ;;  %v266_v30 = vunpack.c.0.s8 %v265_v24 }
  0x3f   :  { %1135 = vmatpush3.bf16.msra.mxu0 %v1156_v5  ;;  %v1169_v20 = vld [vmem:[#allocation8 + $0x90] sm:$0xff]   ;;  %v1170_v21 = vld [vmem:[#allocation8 + $0x20] sm:$0xff]   ;;  %v1171_v22 = vld [vmem:[#allocation8 + $0xd8] sm:$0xff]  }
  0x40   :  { %1047 = vmatpush3.bf16.msra.mxu1 %v1158_v7  ;;  %1066 = vmatprep.subr.bf16.mxu0 %v1159_v10  ;;  %v1172_v26 = vld [vmem:[#allocation8 + $0x68] sm:$0xff]   ;;  %v1173_v27 = vld [vmem:[#allocation8 + $0x98] sm:$0xff]   ;;  %v1175_v29 = vld [vmem:[#allocation8 + $0xe0] sm:$0xff]   ;;  %v1435_v36 = vsub.s32 %v266_v30, %v268_v31 }
  0x41   :  { %1048 = vmatprep.subr.bf16.mxu1 %v1160_v11  ;;  %v1174_v28 = vld [vmem:[#allocation8 + $0x28] sm:$0xff]   ;;  %v1176_v32 = vld [vmem:[#allocation8 + $0x70] sm:$0xff]   ;;  %v1177_v33 = vld [vmem:[#allocation8 + $0xa0] sm:$0xff]  }
  0x42   :  { %1137 = vmatmul.mubr.msk.bf16.vlgmr.msra.gmra.mrb[0].mxu0 %vm218_vm1, %v72_v9  ;;  %v1178_v34 = vld [vmem:[#allocation8 + $0x30] sm:$0xff]   ;;  %v1179_v35 = vld [vmem:[#allocation8 + $0xe8] sm:$0xff]   ;;  %v1180_v37 = vld [vmem:[#allocation8 + $0x78] sm:$0xff]  }
  0x43   :  { %1067 = vmatpush3.bf16.msra.mxu0 %v1161_v12  ;;  %v1181_v38 = vld [vmem:[#allocation8 + $0xa8] sm:$0xff]   ;;  %v1182_v39 = vld [vmem:[#allocation8 + $0x38] sm:$0xff]   ;;  %v1184_v43 = vld [vmem:[#allocation8 + $0xf0] sm:$0xff]  }
  0x44   :  { %1049 = vmatpush3.bf16.msra.mxu1 %v1162_v13  ;;  %1068 = vmatprep.subr.bf16.mxu0 %v1163_v14  ;;  %v70_v40 = vld [vmem:[#allocation3] sm:$0xff]  ;;  %v1186_v46 = vld [vmem:[#allocation8 + $0x140] sm:$0xff]   ;;  %v1190_v55 = vld [vmem:[#allocation8 + $0x148] sm:$0xff]  }
  0x45   :  { %1050 = vmatprep.subr.bf16.mxu1 %v1164_v15  ;;  %v263_v41 = vcombine.high %v70_v40, %v70_v40  ;;  %v270_v42 = vrot.slane %v70_v40, %v1435_v36  ;;  %v1185_v44 = vld [vmem:[#allocation8 + $0xb0] sm:$0xff]   ;;  %v1187_v49 = vld [vmem:[#allocation8 + $0x100] sm:$0xff]   ;;  %v1188_v51 = vld [vmem:[#allocation8 + $0xf8] sm:$0xff]  }
  0x46   :  { %v1189_v53 = vld [vmem:[#allocation8 + $0xb8] sm:$0xff]   ;;  %v1191_v58 = vld [vmem:[#allocation8 + $0x108] sm:$0xff]   ;;  %v1192_v59 = vld [vmem:[#allocation8 + $0x1c0] sm:$0xff]  }
  0x47   :  { %1069 = vmatpush3.bf16.msra.mxu0 %v1165_v16  ;;  %v278_v45 = vcombine.high %v270_v42, %v270_v42  ;;  %v1439_v47 = vrot.slane %v263_v41, %v1435_v36  ;;  %v286_v48 = vrot.slane %v270_v42, %v1435_v36  ;;  %v1193_v60 = vld [vmem:[#allocation8 + $0x150] sm:$0xff]   ;;  %v1194_v62 = vld [vmem:[#allocation8 + $0x180] sm:$0xff]   ;;  %v1196_v0 = vld [vmem:[#allocation8 + $0x1c8] sm:$0xff]  }
  0x48   :  { %1051 = vmatpush3.bf16.msra.mxu1 %v1166_v17  ;;  %1070 = vmatprep.subr.bf16.mxu0 %v1167_v18  ;;  %v1195_v63 = vld [vmem:[#allocation8 + $0x110] sm:$0xff]   ;;  %v1197_v1 = vld [vmem:[#allocation8 + $0x158] sm:$0xff]   ;;  %v1198_v2 = vld [vmem:[#allocation8 + $0x188] sm:$0xff]  }
  0x49   :  { %1052 = vmatprep.subr.bf16.mxu1 %v1168_v19  ;;  %v300_v50 = vrot.slane %v278_v45, %v1435_v36  ;;  %v279_v52 = vcombine.high %v1439_v47, %v1439_v47  ;;  %v308_v57 = vcombine.high %v286_v48, %v286_v48  ;;  %v1199_v3 = vld [vmem:[#allocation8 + $0x118] sm:$0xff]   ;;  %v1200_v4 = vld [vmem:[#allocation8 + $0x1d0] sm:$0xff]   ;;  %v1201_v5 = vld [vmem:[#allocation8 + $0x160] sm:$0xff]   ;;  %v293_v23 = vrot.slane %v1439_v47, %v1435_v36 }
  0x4a   :  { %v1202_v6 = vld [vmem:[#allocation8 + $0x190] sm:$0xff]   ;;  %v1203_v7 = vld [vmem:[#allocation8 + $0x120] sm:$0xff]   ;;  %v1204_v8 = vld [vmem:[#allocation8 + $0x1d8] sm:$0xff]  }
  0x4b   :  { %1071 = vmatpush3.bf16.msra.mxu0 %v1169_v20  ;;  %v310_v54 = vcombine.high %v300_v50, %v300_v50  ;;  %736 = vmatprep.mubr.bf16.mxu1 %v300_v50  ;;  %v307_v56 = vrot.slane %v279_v52, %v1435_v36  ;;  %v1205_v9 = vld [vmem:[#allocation8 + $0x168] sm:$0xff]   ;;  %v1206_v10 = vld [vmem:[#allocation8 + $0x198] sm:$0xff]   ;;  %v1208_v12 = vld [vmem:[#allocation8 + $0x1e0] sm:$0xff]  }
  0x4c   :  { %1053 = vmatpush3.bf16.msra.mxu1 %v1170_v21  ;;  %1072 = vmatprep.subr.bf16.mxu0 %v1171_v22  ;;  %v1207_v11 = vld [vmem:[#allocation8 + $0x128] sm:$0xff]   ;;  %v1209_v13 = vld [vmem:[#allocation8 + $0x170] sm:$0xff]   ;;  %v1210_v14 = vld [vmem:[#allocation8 + $0x1a0] sm:$0xff]  }
  0x4d   :  { %1054 = vmatprep.subr.bf16.mxu1 %v1172_v26  ;;  %776 = vmatprep.mubr.bf16.mxu0 %v310_v54  ;;  %v311_v61 = vcombine.high %v307_v56, %v307_v56  ;;  %v1211_v15 = vld [vmem:[#allocation8 + $0x130] sm:$0xff]   ;;  %v1212_v16 = vld [vmem:[#allocation8 + $0x1e8] sm:$0xff]   ;;  %v1213_v17 = vld [vmem:[#allocation8 + $0x178] sm:$0xff]   ;;  %v309_v26 = vcombine.high %v293_v23, %v293_v23 }
  0x4e   :  { %v1214_v18 = vld [vmem:[#allocation8 + $0x1a8] sm:$0xff]   ;;  %v1215_v19 = vld [vmem:[#allocation8 + $0x138] sm:$0xff]   ;;  %v1216_v20 = vld [vmem:[#allocation8 + $0x1f0] sm:$0xff]  }
  0x4f   :  { %1073 = vmatpush3.bf16.msra.mxu0 %v1173_v27  ;;  %v1217_v21 = vld [vmem:[#allocation8 + $0x1b0] sm:$0xff]   ;;  %v1218_v22 = vld [vmem:[#allocation8 + $0x1f8] sm:$0xff]  }
  0x50   :  { %1055 = vmatpush3.bf16.msra.mxu1 %v1174_v28  ;;  %1074 = vmatprep.subr.bf16.mxu0 %v1175_v29  ;;  %v1219_v24 = vld [vmem:[#allocation8 + $0x1b8] sm:$0xff]  }
  0x51   :  { %1056 = vmatprep.subr.bf16.mxu1 %v1176_v32 }
  0x53   :  { %1075 = vmatpush3.bf16.msra.mxu0 %v1177_v33 }
  0x54   :  { %1057 = vmatpush3.bf16.msra.mxu1 %v1178_v34  ;;  %1076 = vmatprep.subr.bf16.mxu0 %v1179_v35 }
  0x55   :  { %1058 = vmatprep.subr.bf16.mxu1 %v1180_v37 }
  0x57   :  { %1077 = vmatpush3.bf16.msra.mxu0 %v1181_v38 }
  0x58   :  { %1059 = vmatpush3.bf16.msra.mxu1 %v1182_v39  ;;  %1078 = vmatprep.subr.bf16.mxu0 %v1184_v43 }
  0x59   :  { %1088 = vmatprep.subr.bf16.mxu1 %v1186_v46 }
  0x5b   :  { %1079 = vmatpush3.bf16.msra.mxu0 %v1185_v44  ;;  %737 = vmatmul.mubr.bf16.vlgmr.msra.gmra.mrb[0].mxu1 %v286_v48 }
  0x5c   :  { %1080 = vmatprep.subr.bf16.mxu0 %v1188_v51  ;;  %1089 = vmatpush3.bf16.msra.mxu1 %v1187_v49 }
  0x5d   :  { %1090 = vmatprep.subr.bf16.mxu1 %v1190_v55  ;;  %816 = vmatprep.mubr.bf16.mxu1 %v307_v56 }
  0x5f   :  { %1081 = vmatpush3.bf16.msra.mxu0 %v1189_v53  ;;  %v1036_v53 = vld [vmem:[%s1474_s5] ss:$0 sm:$0xff]  ;;  %s1334_s5 = smov 32  }
  0x60   :  { %1110 = vmatprep.subr.bf16.mxu0 %v1192_v59  ;;  %1091 = vmatpush3.bf16.msra.mxu1 %v1191_v58 }
  0x61   :  { %1092 = vmatprep.subr.bf16.mxu1 %v1193_v60  ;;  %v873_v60 = vand.u32 127, %v267_v25 }
  0x62   :  { %777 = vmatmul.mubr.bf16.vlgmr.msra.gmra.mrb[4].mxu0 %v308_v57 }
  0x63   :  { %1111 = vmatpush3.bf16.msra.mxu0 %v1194_v62  ;;  %856 = vmatprep.mubr.bf16.mxu0 %v311_v61  ;;  %vm874_vm2 = vcmp.ge.s32.totalorder %v873_v60, 64  ;;  %vm875_vm3 = vcmp.lt.s32.totalorder %v873_v60, 96 }
  0x64   :  { %1112 = vmatprep.subr.bf16.mxu0 %v1196_v0  ;;  %1093 = vmatpush3.bf16.msra.mxu1 %v1195_v63  ;;  %vm876_vm4 = vmand %vm874_vm2, %vm875_vm3  ;;  %v73_v0 = vld [vmem:[#allocation6] sm:$0x3] }
  0x65   :  { %1094 = vmatprep.subr.bf16.mxu1 %v1197_v1 }
  0x67   :  { %1113 = vmatpush3.bf16.msra.mxu0 %v1198_v2 }
  0x68   :  { %1114 = vmatprep.subr.bf16.mxu0 %v1200_v4  ;;  %1095 = vmatpush3.bf16.msra.mxu1 %v1199_v3  ;;  %v1038_v3 = vld [vmem:[%s1475_s6] ss:$0 sm:$0xff]  ;;  %s1338_s6 = smov [#allocation9]  }
  0x69   :  { %1096 = vmatprep.subr.bf16.mxu1 %v1201_v5  ;;  %s959_s28 = sshll.u32 %s1338_s6, 4  ;;  %s960_s28 = int_to_ptr.vmem [resolvable:$true] %s959_s28 }
  0x6a   :  { %s1298_s29 = scalar_lea.vmem %s960_s28, 32  ;;  %p1303_p11 = scmp.lt.s32.totalorder %s960_s28, %s960_s28 }
  0x6b   :  { %1115 = vmatpush3.bf16.msra.mxu0 %v1202_v6  ;;  %p1299_p10 = scmp.ne.s32.totalorder %s960_s28, %s1298_s29  ;;  %p1304_p12 = scmp.lt.s32.totalorder %s1298_s29, %s1298_s29 }
  0x6c   :  { %1116 = vmatprep.subr.bf16.mxu0 %v1204_v8  ;;  %1097 = vmatpush3.bf16.msra.mxu1 %v1203_v7 }
  0x6d   :  { %1098 = vmatprep.subr.bf16.mxu1 %v1205_v9  ;;  %p1305_p13 = por %p1304_p12, %p1303_p11 }
  0x6f   :  { %1117 = vmatpush3.bf16.msra.mxu0 %v1206_v10  ;;  %p1306_p0 = pnand %p1305_p13, %p1299_p10 }
  0x70   :  { %1118 = vmatprep.subr.bf16.mxu0 %v1208_v12  ;;  %1099 = vmatpush3.bf16.msra.mxu1 %v1207_v11 }
  0x71   :  { %1100 = vmatprep.subr.bf16.mxu1 %v1209_v13 }
  0x73   :  { %1119 = vmatpush3.bf16.msra.mxu0 %v1210_v14  ;;  %v1039_v14 = vld [vmem:[#allocation2] ss:$0 sm:$0xff] }
  0x74   :  { %1120 = vmatprep.subr.bf16.mxu0 %v1212_v16  ;;  %1101 = vmatpush3.bf16.msra.mxu1 %v1211_v15 }
  0x75   :  { %1102 = vmatprep.subr.bf16.mxu1 %v1213_v17 }
  0x77   :  { %1121 = vmatpush3.bf16.msra.mxu0 %v1214_v18 }
  0x78   :  { %1122 = vmatprep.subr.bf16.mxu0 %v1216_v20  ;;  %1103 = vmatpush3.bf16.msra.mxu1 %v1215_v19 }
  0x7b   :  { %1123 = vmatpush3.bf16.msra.mxu0 %v1217_v21  ;;  %817 = vmatmul.mubr.bf16.vlgmr.msra.gmra.mrb[4].mxu1 %v293_v23 }
  0x7c   :  { %1124 = vmatprep.subr.bf16.mxu0 %v1218_v22 }
  0x7f   :  { %1125 = vmatpush3.bf16.msra.mxu0 %v1219_v24 }
  0x82   :  { %857 = vmatmul.mubr.bf16.vlgmr.msra.gmra.mrb[8].mxu0 %v309_v26 }
 0x115   :  { %v256_v27 = vpop.f32.mrb[0].mxu0 }
 0x116   :  { %v1138_v28 = vpop.f32.mrb[1].mxu0 }
 0x117   :  { %v259_v29 = vpop.f32.mrb[2].mxu0 }
 0x118   :  { %v1139_v30 = vpop.f32.mrb[3].mxu0 }
 0x12e   :  { %v1060_v31 = vpop.f32.mrb[0].mxu1 }
 0x12f   :  { %v1061_v32 = vpop.f32.mrb[1].mxu1 }
 0x130   :  { %v1062_v33 = vadd.f32 %v1061_v32, %v1060_v31  ;;  %v1063_v34 = vpop.f32.mrb[2].mxu1 }
 0x131   :  { %v1064_v35 = vpop.f32.mrb[3].mxu1 }
 0x132   :  { %v739_v37 = vadd.f32 %v1062_v33, %v256_v27 }
 0x135   :  { %v1082_v38 = vpop.f32.mrb[4].mxu0 }
 0x136   :  { %v1083_v36 = vpop.f32.mrb[5].mxu0 }
 0x137   :  { %v1084_v39 = vadd.f32 %v1083_v36, %v1082_v38  ;;  %v1085_v40 = vpop.f32.mrb[6].mxu0 }
 0x138   :  { %v1086_v41 = vpop.f32.mrb[7].mxu0 }
 0x139   :  { %v779_v42 = vadd.f32 %v1084_v39, %v739_v37 }
 0x14e   :  { %v1104_v43 = vpop.f32.mrb[4].mxu1 }
 0x14f   :  { %v1105_v44 = vpop.f32.mrb[5].mxu1 }
 0x150   :  { %v1106_v45 = vadd.f32 %v1105_v44, %v1104_v43  ;;  %v1107_v46 = vpop.f32.mrb[6].mxu1 }
 0x151   :  { %v1108_v47 = vpop.f32.mrb[7].mxu1 }
 0x152   :  { %v819_v48 = vadd.f32 %v1106_v45, %v779_v42 }
 0x155   :  { %v1126_v49 = vpop.f32.mrb[8].mxu0 }
 0x156   :  { %v1127_v50 = vpop.f32.mrb[9].mxu0 }
 0x157   :  { %v1128_v51 = vadd.f32 %v1127_v50, %v1126_v49  ;;  %v1129_v52 = vpop.f32.mrb[10].mxu0 }
 0x158   :  { %v1130_v54 = vpop.f32.mrb[11].mxu0 }
 0x159   :  { %v859_v55 = vadd.f32 %v1128_v51, %v819_v48 }
 0x15b   :  { %v871_v56 = vadd.f32 %v1036_v53, %v859_v55 }
 0x15d   :  { %v1037_v57 = vmul.f32 -1.442695, %v871_v56 }
 0x15f   :  { %1220 = vpow2.f32 %v1037_v57 }
 0x160   :  { %1222 = vtanh.f32 %v871_v56 }
 0x169   :  { %v1221_v58 = vpop.eup %1220 }
 0x16a   :  { %v881_v59 = vadd.f32 1.0, %v1221_v58  ;;  %v1223_v61 = vpop.eup %1222 }
 0x16c   :  { %1224 = vrcp.f32 %v881_v59 }
 0x176   :  { %v1225_v62 = vpop.eup %1224 }
 0x177   :  { %v884_v63 = vsel %vm876_vm4, %v1223_v61, %v1225_v62 }
 0x178   :  { %891 = vrot.lane.b32.xlu0 %v884_v63, %s1329_s0 }
 0x17c   :  { %886 = vrot.lane.b32.xlu0 %v73_v0, %s1334_s5 }
 0x180   :  { %912 = vrot.lane.b32.xlu0 %v1038_v3, %s1335_s26 }
 0x1ea   :  { %v892_v1 = vpop.permute.xlu0 %891 }
 0x1eb   :  { %v894_v2 = vmul.f32 %v892_v1, %v884_v63 }
 0x1ed   :  { %896 = vrot.lane.b32.xlu1 %v894_v2, %s1334_s5 }
 0x1ee   :  { %v887_v25 = vpop.permute.xlu0 %886 }
 0x1ef   :  { %v889_v4 = vmul.f32 %v887_v25, %v884_v63 }
 0x1f2   :  { %v913_v9 = vpop.permute.xlu0 %912 }
 0x25f   :  { %v897_v5 = vpop.permute.xlu1 %896 }
 0x260   :  { %v899_v6 = vadd.f32 %v897_v5, %v889_v4 }
 0x262   :  { %1226 = vtanh.f32 %v899_v6 }
 0x26c   :  { %v1227_v7 = vpop.eup %1226 }
 0x26d   :  { %902 = vrot.lane.b32.xlu1 %v1227_v7, %s1329_s0 }
 0x2df   :  { %v903_v8 = vpop.permute.xlu1 %902 }
 0x2e0   :  { %v905_v10 = vmul.f32 %v903_v8, %v884_v63 }
 0x2e2   :  { %v915_v11 = vmul.f32 %v913_v9, %v905_v10 }
 0x2e4   :  { %917 = vrot.lane.b32.xlu1 %v915_v11, %s1334_s5 }
 0x2e8   :  { %939 = vrot.lane.b32.xlu1 %v905_v10, %s1336_s27 }
 0x2ec   :  { %943 = vrot.lane.b32.xlu1 %v899_v6, %s1337_s2 }
 0x356   :  { %v918_v12 = vpop.permute.xlu1 %917 }
 0x357   :  { %v921_v13 = vsel %vm920_vm5, %v918_v12, 0.0 }
 0x358   :  { %922 = vadd.xlane.f32.xlu0 %v921_v13 }
 0x35a   :  { %v940_v20 = vpop.permute.xlu1 %939 }
 0x35e   :  { %v944_v22 = vpop.permute.xlu1 %943 }
 0x3e5   :  { %v923_v15 = vpop.xlane.xlu0 %922 }
 0x3e6   :  { %v931_v16 = vadd.f32 %v1039_v14, %v923_v15 }
 0x3e8   :  { %v1040_v17 = vmul.f32 -1.442695, %v931_v16 }
 0x3ea   :  { %1228 = vpow2.f32 %v1040_v17 }
 0x3f4   :  { %v1229_v18 = vpop.eup %1228 }
 0x3f5   :  { %v935_v19 = vadd.f32 1.0, %v1229_v18 }
 0x3f7   :  { %1230 = vrcp.f32 %v935_v19 }
 0x401   :  { %v1231_v21 = vpop.eup %1230 }
 0x402   :  { %v947_v23 = vsel %vm946_vm6, %v1231_v21, %v940_v20 }
 0x403   :  { %v949_v24 = vsel %vm948_vm7, %v947_v23, %v944_v22 }
 0x404   :  { %v951_v26 = vsel %vm950_vm8, %v949_v24, 0.0 }
 0x405   :  { %952 = vst [vmem:[#allocation9] sm:$0x3] %v951_v26 }
 0x406   :  { %1309 = shalt.err (!%p1306_p0)
}
 0x407   :  { %s1310_s11 = scalar_lea.hbm %s1477_s8, 32 }
 0x408   :  { %p1311_p1 = scmp.ne.s32.totalorder %s1477_s8, %s1310_s11  ;;  %p1314_p2 = scmp.lt.u32.totalorder %s1310_s11, %s1477_s8 }
 0x40a   :  { %p1316_p3 = pnand %p1314_p2, %p1311_p1 }
 0x40c   :  { %1319 = shalt.err (!%p1316_p3)
}
 0x40d   :  { %962 = dma.vmem_to_hbm [thread:$0]  %s960_s28, 32, %s1477_s8, [#allocation5]  }
 0x40e   :  { %1324 = dma.done.wait [#allocation5], 32  }
 0x40f   :  { %1325 = vsyncadd [#allocation5], 4294967264 }
 0x410   :  { %966 = vsyncpa [#allocation4], 1 }
 0x411   :  { %967 = vsyncpa [#allocation7], 1 }
 0x412   :  { %968 = vsyncpa [#allocation5], 1 }

</bundles_post_ra>
